<compile_context>
chip_gen: v7x
topology: tpu7x:2x2x1
jax: 0.10.0
libtpu: 0.0.40
codegen_flags: <defaults>
</compile_context>

<pallas_src>
import jax
import jax.numpy as jnp
from jax.experimental import pallas as pl
from jax.experimental.pallas import tpu as pltpu


LANE = 128


def _round_up(x, m):
    return (x + m - 1) // m * m


def _cdiv(a, b):
    return -(-a // b)


def _sublane(dtype):
    # bf16 packs 16 rows per vreg sublane group; f32 packs 8.
    return 16 if jnp.dtype(dtype).itemsize == 2 else 8


# ---------------------------------------------------------------------------
# Kernels
# ---------------------------------------------------------------------------

def _mlp(x, w1, b1, w2, b2, w3, b3, w4, b4):
    """relu(relu(relu(x@W1+b1)@W2+b2)@W3+b3)@W4+b4.

    MXU matmuls with f32 accumulation; bias add + ReLU run in f32 (v5e has no
    bf16 VPU). Returns an f32 tile.
    """
    h = jnp.dot(x, w1, preferred_element_type=jnp.float32)
    h = jnp.maximum(h + b1, 0.0)
    h = jnp.dot(h.astype(w2.dtype), w2, preferred_element_type=jnp.float32)
    h = jnp.maximum(h + b2, 0.0)
    h = jnp.dot(h.astype(w3.dtype), w3, preferred_element_type=jnp.float32)
    h = jnp.maximum(h + b3, 0.0)
    out = jnp.dot(h.astype(w4.dtype), w4, preferred_element_type=jnp.float32)
    return out + b4


def qnetwork_kernel(x_ref, w1_ref, b1_ref, w2_ref, b2_ref,
                    w3_ref, b3_ref, w4_ref, b4_ref, out_ref):
    out = _mlp(x_ref[...],
               w1_ref[...], b1_ref[...], w2_ref[...], b2_ref[...],
               w3_ref[...], b3_ref[...], w4_ref[...], b4_ref[...])
    out_ref[...] = out.astype(out_ref.dtype)


def qnetwork_pair_kernel(xp_ref, xt_ref,
                         w1p, b1p, w2p, b2p, w3p, b3p, w4p, b4p,
                         w1t, b1t, w2t, b2t, w3t, b3t, w4t, b4t,
                         outp_ref, outt_ref):
    """Fused policy-net + target-net forward (shared launch, resident weights)."""
    outp_ref[...] = _mlp(xp_ref[...],
                         w1p[...], b1p[...], w2p[...], b2p[...],
                         w3p[...], b3p[...], w4p[...], b4p[...]
                         ).astype(outp_ref.dtype)
    outt_ref[...] = _mlp(xt_ref[...],
                         w1t[...], b1t[...], w2t[...], b2t[...],
                         w3t[...], b3t[...], w4t[...], b4t[...]
                         ).astype(outt_ref.dtype)


# ---------------------------------------------------------------------------
# Parameter preparation (runs once, cached outside the per-call wrapper)
# ---------------------------------------------------------------------------

class PreparedQNet:
    """Padded + cast QNetwork parameters.

    Zero-padding keeps the math exact: padded K columns of x multiply padded
    (zero) rows of W1, padded bias entries are zero so ReLU of padded hidden
    columns stays zero, and padded output columns / batch rows are sliced off.
    On v6e/v7x pass compute_dtype=jnp.bfloat16 (full-rate MXU, half the DMA
    bytes); accumulation and bias/ReLU stay f32 either way.
    """

    def __init__(self, params, compute_dtype=jnp.float32):
        self.compute_dtype = jnp.dtype(compute_dtype)
        self.sub = _sublane(self.compute_dtype)

        self.n_obs = params["w1"].shape[0]
        self.n_actions = params["w4"].shape[1]
        self.k_pad = _round_up(self.n_obs, self.sub)       # layer-1 contraction
        h1_pad = _round_up(params["w1"].shape[1], LANE)     # hidden-1 lanes
        h2_pad = _round_up(params["w2"].shape[1], LANE)     # hidden-2 lanes
        self.out_pad = _round_up(self.n_actions, LANE)      # lane-dense output

        def pad2(a, rows, cols, dtype):
            return jnp.pad(a, ((0, rows - a.shape[0]),
                               (0, cols - a.shape[1]))).astype(dtype)

        cd = self.compute_dtype
        self.weights = (
            pad2(params["w1"], self.k_pad, h1_pad, cd),
            pad2(params["b1"], 1, h1_pad, jnp.float32),
            pad2(params["w2"], h1_pad, h2_pad, cd),
            pad2(params["b2"], 1, h2_pad, jnp.float32),
            pad2(params["w3"], h2_pad, h2_pad, cd),
            pad2(params["b3"], 1, h2_pad, jnp.float32),
            pad2(params["w4"], h2_pad, self.out_pad, cd),
            pad2(params["b4"], 1, self.out_pad, jnp.float32),
        )


# ---------------------------------------------------------------------------
# Forward wrappers
# ---------------------------------------------------------------------------

def _batch_tiling(batch, sub, tile_b):
    """Pick (tile_rows, padded_batch, grid_steps) minimizing batch padding.

    When one step would cover a large batch, split into 2 steps so the
    'parallel' axis shards across v7x's two TensorCores (harmless elsewhere).
    """
    n_steps = max(1, _cdiv(batch, tile_b))
    if n_steps == 1 and batch >= 2 * max(sub, LANE):
        n_steps = 2
    tb = _round_up(_cdiv(batch, n_steps), sub)
    b_pad = n_steps * tb
    return tb, b_pad, n_steps


def _compiler_params():
    return pltpu.CompilerParams(
        dimension_semantics=("parallel",),
        # v7x ceiling (64 MiB physical / 32 MiB scoped). Resident weights are
        # <0.3 MiB; double-buffered x/out tiles at tb<=4096 stay far below it.
        vmem_limit_bytes=32 * 1024 * 1024,
    )


def qnetwork_forward(x, prep: PreparedQNet, *, tile_b=2048):
    """QNetwork forward via one Pallas kernel.

    x: (batch, n_observations) float32. prep: PreparedQNet (padded params).
    """
    batch, n_obs = x.shape
    tb, b_pad, n_steps = _batch_tiling(batch, prep.sub, tile_b)

    x_p = jnp.pad(x, ((0, b_pad - batch), (0, prep.k_pad - n_obs))
                  ).astype(prep.compute_dtype)

    w1, _, w2, _, w3, _, w4, _ = prep.weights
    k_pad, h1_pad = w1.shape
    h2_pad = w2.shape[1]
    out_pad = w4.shape[1]

    # x / out stream along the batch grid; weights & biases are resident
    # (constant index_map -> loaded into VMEM once, reused every grid step).
    x_spec = pl.BlockSpec((tb, k_pad), lambda i: (i, 0))
    out_spec = pl.BlockSpec((tb, out_pad), lambda i: (i, 0))

    def resident(a):
        return pl.BlockSpec(a.shape, lambda i: (0, 0))

    in_specs = [x_spec] + [resident(a) for a in prep.weights]

    flops = 2 * b_pad * (k_pad * h1_pad + h1_pad * h2_pad
                         + h2_pad * h2_pad + h2_pad * out_pad)
    w_bytes = sum(int(a.size) * a.dtype.itemsize for a in prep.weights)
    bytes_accessed = (int(x_p.size) * prep.compute_dtype.itemsize
                      + w_bytes + b_pad * out_pad * 4)

    out_padded = pl.pallas_call(
        qnetwork_kernel,
        grid=(n_steps,),
        out_shape=jax.ShapeDtypeStruct((b_pad, out_pad), jnp.float32),
        in_specs=in_specs,
        out_specs=out_spec,
        compiler_params=_compiler_params(),
        cost_estimate=pl.CostEstimate(
            flops=flops, transcendentals=0, bytes_accessed=bytes_accessed),
    )(x_p, *prep.weights)

    return out_padded[:batch, :prep.n_actions]


def qnetwork_forward_pair(x_policy, x_target,
                          prep_policy: PreparedQNet, prep_target: PreparedQNet,
                          *, tile_b=2048):
    """Fused policy-net + target-net forward in a single pallas_call.

    Halves per-DQN-step launch/prologue overhead in the launch-bound batch=8
    regime: both weight sets (<0.5 MiB) stay resident, both x tensors stream.
    """
    assert prep_policy.compute_dtype == prep_target.compute_dtype
    assert prep_policy.k_pad == prep_target.k_pad
    assert prep_policy.out_pad == prep_target.out_pad
    batch, n_obs = x_policy.shape
    assert x_target.shape == x_policy.shape

    prep = prep_policy
    tb, b_pad, n_steps = _batch_tiling(batch, prep.sub, tile_b)

    def pad_x(x):
        return jnp.pad(x, ((0, b_pad - batch), (0, prep.k_pad - n_obs))
                       ).astype(prep.compute_dtype)

    xp = pad_x(x_policy)
    xt = pad_x(x_target)

    w1, _, w2, _, w3, _, w4, _ = prep.weights
    k_pad, h1_pad = w1.shape
    h2_pad = w2.shape[1]
    out_pad = w4.shape[1]

    x_spec = pl.BlockSpec((tb, k_pad), lambda i: (i, 0))
    out_spec = pl.BlockSpec((tb, out_pad), lambda i: (i, 0))

    def resident(a):
        return pl.BlockSpec(a.shape, lambda i: (0, 0))

    in_specs = ([x_spec, x_spec]
                + [resident(a) for a in prep_policy.weights]
                + [resident(a) for a in prep_target.weights])

    flops = 4 * b_pad * (k_pad * h1_pad + h1_pad * h2_pad
                         + h2_pad * h2_pad + h2_pad * out_pad)
    w_bytes = sum(int(a.size) * a.dtype.itemsize
                  for a in (prep_policy.weights + prep_target.weights))
    bytes_accessed = (2 * int(xp.size) * prep.compute_dtype.itemsize
                      + w_bytes + 2 * b_pad * out_pad * 4)

    out_p, out_t = pl.pallas_call(
        qnetwork_pair_kernel,
        grid=(n_steps,),
        out_shape=(jax.ShapeDtypeStruct((b_pad, out_pad), jnp.float32),
                   jax.ShapeDtypeStruct((b_pad, out_pad), jnp.float32)),
        in_specs=in_specs,
        out_specs=[out_spec, out_spec],
        compiler_params=_compiler_params(),
        cost_estimate=pl.CostEstimate(
            flops=flops, transcendentals=0, bytes_accessed=bytes_accessed),
    )(xp, xt, *prep_policy.weights, *prep_target.weights)

    return (out_p[:batch, :prep_policy.n_actions],
            out_t[:batch, :prep_target.n_actions])


# ---------------------------------------------------------------------------
# Reference / init (for the self-test)
# ---------------------------------------------------------------------------

def init_params(key, n_observations=10, n_actions=9, nn_l1=16, nn_l2=128):
    """Deterministic init mimicking torch.nn.Linear's U(-1/sqrt(fan_in), 1/sqrt(fan_in))."""
    dims = [(n_observations, nn_l1), (nn_l1, nn_l2),
            (nn_l2, nn_l2), (nn_l2, n_actions)]
    params = {}
    keys = jax.random.split(key, 2 * len(dims))
    for i, (fan_in, fan_out) in enumerate(dims):
        bound = 1.0 / (fan_in ** 0.5)
        params[f"w{i + 1}"] = jax.random.uniform(
            keys[2 * i], (fan_in, fan_out), minval=-bound, maxval=bound,
            dtype=jnp.float32)
        params[f"b{i + 1}"] = jax.random.uniform(
            keys[2 * i + 1], (1, fan_out), minval=-bound, maxval=bound,
            dtype=jnp.float32)
    return params


def reference_forward(x, params):
    h = jnp.maximum(x @ params["w1"] + params["b1"], 0.0)
    h = jnp.maximum(h @ params["w2"] + params["b2"], 0.0)
    h = jnp.maximum(h @ params["w3"] + params["b3"], 0.0)
    return h @ params["w4"] + params["b4"]


if __name__ == "__main__":
    key = jax.random.PRNGKey(0)
    k_params, k_params_t, k_x, k_xt = jax.random.split(key, 4)

    n_observations, n_actions, nn_l1, nn_l2 = 10, 9, 16, 128
    batch = 8

    params = init_params(k_params, n_observations, n_actions, nn_l1, nn_l2)
    params_t = init_params(k_params_t, n_observations, n_actions, nn_l1, nn_l2)
    x = jax.random.normal(k_x, (batch, n_observations), dtype=jnp.float32)
    xt = jax.random.normal(k_xt, (batch, n_observations), dtype=jnp.float32)

    ref = reference_forward(x, params)
    ref_t = reference_forward(xt, params_t)

    # --- exact-semantics f32 path; params padded once and reused ------------
    prep_f32 = PreparedQNet(params, jnp.float32)
    fwd = jax.jit(lambda xx: qnetwork_forward(xx, prep_f32))
    out = jax.block_until_ready(fwd(x))
    assert out.shape == (batch, n_actions)
    assert jnp.allclose(out, ref, atol=1e-4, rtol=1e-4)

    # --- bf16 weight/activation path (recommended default on v6e/v7x) -------
    prep_bf16 = PreparedQNet(params, jnp.bfloat16)
    out_bf16 = jax.block_until_ready(qnetwork_forward(x, prep_bf16))
    assert out_bf16.shape == (batch, n_actions)
    assert jnp.allclose(out_bf16, ref, atol=5e-2, rtol=5e-2)

    # --- fused policy + target forward (one launch, shared resident weights)
    prep_t_f32 = PreparedQNet(params_t, jnp.float32)
    out_p, out_t = jax.block_until_ready(
        qnetwork_forward_pair(x, xt, prep_f32, prep_t_f32))
    assert jnp.allclose(out_p, ref, atol=1e-4, rtol=1e-4)
    assert jnp.allclose(out_t, ref_t, atol=1e-4, rtol=1e-4)

    # --- larger batch: exercises >=2 grid steps (v7x megacore) + minimal-pad
    #     tile selection (batch=300 -> 2 steps of 152 rows, 4 rows padding) ---
    x_big = jax.random.normal(k_x, (300, n_observations), dtype=jnp.float32)
    out_big = jax.block_until_ready(qnetwork_forward(x_big, prep_f32))
    assert out_big.shape == (300, n_actions)
    assert jnp.allclose(out_big, reference_forward(x_big, params),
                        atol=1e-4, rtol=1e-4)

    print("KERNEL_OK")
</pallas_src>

<mosaic_0001>
module attributes {stable_mosaic.version = 11 : i64} {
  func.func @qnetwork_kernel(%arg0: i32, %arg1: memref<8x16xf32, #tpu.memory_space<vmem>>, %arg2: memref<16x128xf32, #tpu.memory_space<vmem>>, %arg3: memref<1x128xf32, #tpu.memory_space<vmem>>, %arg4: memref<128x128xf32, #tpu.memory_space<vmem>>, %arg5: memref<1x128xf32, #tpu.memory_space<vmem>>, %arg6: memref<128x128xf32, #tpu.memory_space<vmem>>, %arg7: memref<1x128xf32, #tpu.memory_space<vmem>>, %arg8: memref<128x128xf32, #tpu.memory_space<vmem>>, %arg9: memref<1x128xf32, #tpu.memory_space<vmem>>, %arg10: memref<8x128xf32, #tpu.memory_space<vmem>>) attributes {dimension_semantics = [#tpu.dimension_semantics<parallel>], iteration_bounds = array<i64: 1>, scalar_prefetch = 0 : i64, scratch_operands = 0 : i64, tpu.core_type = #tpu.core_type<tc>, window_params = [{transform_indices = @transform_0, window_bounds = array<i64: 8, 16>}, {pipeline_mode = #tpu.pipeline_mode<synchronous>, transform_indices = @transform_1, window_bounds = array<i64: 16, 128>}, {pipeline_mode = #tpu.pipeline_mode<synchronous>, transform_indices = @transform_2, window_bounds = array<i64: 1, 128>}, {pipeline_mode = #tpu.pipeline_mode<synchronous>, transform_indices = @transform_3, window_bounds = array<i64: 128, 128>}, {pipeline_mode = #tpu.pipeline_mode<synchronous>, transform_indices = @transform_4, window_bounds = array<i64: 1, 128>}, {pipeline_mode = #tpu.pipeline_mode<synchronous>, transform_indices = @transform_5, window_bounds = array<i64: 128, 128>}, {pipeline_mode = #tpu.pipeline_mode<synchronous>, transform_indices = @transform_6, window_bounds = array<i64: 1, 128>}, {pipeline_mode = #tpu.pipeline_mode<synchronous>, transform_indices = @transform_7, window_bounds = array<i64: 128, 128>}, {pipeline_mode = #tpu.pipeline_mode<synchronous>, transform_indices = @transform_8, window_bounds = array<i64: 1, 128>}, {transform_indices = @transform_9, window_bounds = array<i64: 8, 128>}]} {
    %c0 = arith.constant 0 : index
    %c0_0 = arith.constant 0 : index
    %0 = vector.load %arg1[%c0, %c0_0] : memref<8x16xf32, #tpu.memory_space<vmem>>, vector<8x16xf32>
    %c0_1 = arith.constant 0 : index
    %c0_2 = arith.constant 0 : index
    %1 = vector.load %arg2[%c0_1, %c0_2] : memref<16x128xf32, #tpu.memory_space<vmem>>, vector<16x128xf32>
    %c0_3 = arith.constant 0 : index
    %c0_4 = arith.constant 0 : index
    %2 = vector.load %arg3[%c0_3, %c0_4] : memref<1x128xf32, #tpu.memory_space<vmem>>, vector<1x128xf32>
    %c0_5 = arith.constant 0 : index
    %c0_6 = arith.constant 0 : index
    %3 = vector.load %arg4[%c0_5, %c0_6] : memref<128x128xf32, #tpu.memory_space<vmem>>, vector<128x128xf32>
    %c0_7 = arith.constant 0 : index
    %c0_8 = arith.constant 0 : index
    %4 = vector.load %arg5[%c0_7, %c0_8] : memref<1x128xf32, #tpu.memory_space<vmem>>, vector<1x128xf32>
    %c0_9 = arith.constant 0 : index
    %c0_10 = arith.constant 0 : index
    %5 = vector.load %arg6[%c0_9, %c0_10] : memref<128x128xf32, #tpu.memory_space<vmem>>, vector<128x128xf32>
    %c0_11 = arith.constant 0 : index
    %c0_12 = arith.constant 0 : index
    %6 = vector.load %arg7[%c0_11, %c0_12] : memref<1x128xf32, #tpu.memory_space<vmem>>, vector<1x128xf32>
    %c0_13 = arith.constant 0 : index
    %c0_14 = arith.constant 0 : index
    %7 = vector.load %arg8[%c0_13, %c0_14] : memref<128x128xf32, #tpu.memory_space<vmem>>, vector<128x128xf32>
    %c0_15 = arith.constant 0 : index
    %c0_16 = arith.constant 0 : index
    %8 = vector.load %arg9[%c0_15, %c0_16] : memref<1x128xf32, #tpu.memory_space<vmem>>, vector<1x128xf32>
    %cst = arith.constant dense<0.000000e+00> : vector<8x128xf32>
    %9 = tpu.matmul %0, %1, %cst {dimension_numbers = #tpu.dot_dimension_numbers<[1], [0], [0], [1], [0, 0, 1, 1], [], []>} : vector<8x16xf32>, vector<16x128xf32>, vector<8x128xf32> -> vector<8x128xf32>
    %10 = vector.broadcast %2 : vector<1x128xf32> to vector<8x128xf32>
    %11 = arith.addf %9, %10 : vector<8x128xf32>
    %cst_17 = arith.constant 0.000000e+00 : f32
    %12 = vector.broadcast %cst_17 : f32 to vector<8x128xf32>
    %13 = arith.maximumf %11, %12 : vector<8x128xf32>
    %cst_18 = arith.constant dense<0.000000e+00> : vector<8x128xf32>
    %14 = tpu.matmul %13, %3, %cst_18 {dimension_numbers = #tpu.dot_dimension_numbers<[1], [0], [0], [1], [0, 0, 1, 1], [], []>} : vector<8x128xf32>, vector<128x128xf32>, vector<8x128xf32> -> vector<8x128xf32>
    %15 = vector.broadcast %4 : vector<1x128xf32> to vector<8x128xf32>
    %16 = arith.addf %14, %15 : vector<8x128xf32>
    %cst_19 = arith.constant 0.000000e+00 : f32
    %17 = vector.broadcast %cst_19 : f32 to vector<8x128xf32>
    %18 = arith.maximumf %16, %17 : vector<8x128xf32>
    %cst_20 = arith.constant dense<0.000000e+00> : vector<8x128xf32>
    %19 = tpu.matmul %18, %5, %cst_20 {dimension_numbers = #tpu.dot_dimension_numbers<[1], [0], [0], [1], [0, 0, 1, 1], [], []>} : vector<8x128xf32>, vector<128x128xf32>, vector<8x128xf32> -> vector<8x128xf32>
    %20 = vector.broadcast %6 : vector<1x128xf32> to vector<8x128xf32>
    %21 = arith.addf %19, %20 : vector<8x128xf32>
    %cst_21 = arith.constant 0.000000e+00 : f32
    %22 = vector.broadcast %cst_21 : f32 to vector<8x128xf32>
    %23 = arith.maximumf %21, %22 : vector<8x128xf32>
    %cst_22 = arith.constant dense<0.000000e+00> : vector<8x128xf32>
    %24 = tpu.matmul %23, %7, %cst_22 {dimension_numbers = #tpu.dot_dimension_numbers<[1], [0], [0], [1], [0, 0, 1, 1], [], []>} : vector<8x128xf32>, vector<128x128xf32>, vector<8x128xf32> -> vector<8x128xf32>
    %25 = vector.broadcast %8 : vector<1x128xf32> to vector<8x128xf32>
    %26 = arith.addf %24, %25 : vector<8x128xf32>
    %c0_23 = arith.constant 0 : index
    %c0_24 = arith.constant 0 : index
    %27 = vector.load %arg10[%c0_23, %c0_24] : memref<8x128xf32, #tpu.memory_space<vmem>>, vector<8x128xf32>
    tpu.vector_store %arg10[%c0_23, %c0_24], %26 {strides = array<i32>} : memref<8x128xf32, #tpu.memory_space<vmem>>, vector<8x128xf32>,
    return
  }
  func.func @transform_0(%arg0: i32) -> (i32, i32) {
    %c0_i32 = arith.constant 0 : i32
    %c0_i32_0 = arith.constant 0 : i32
    return %arg0, %c0_i32 : i32, i32
  }
  func.func @transform_1(%arg0: i32) -> (i32, i32) {
    %c0_i32 = arith.constant 0 : i32
    %c0_i32_0 = arith.constant 0 : i32
    %c0_i32_1 = arith.constant 0 : i32
    return %c0_i32, %c0_i32_0 : i32, i32
  }
  func.func @transform_2(%arg0: i32) -> (i32, i32) {
    %c0_i32 = arith.constant 0 : i32
    %c0_i32_0 = arith.constant 0 : i32
    %c0_i32_1 = arith.constant 0 : i32
    return %c0_i32, %c0_i32_0 : i32, i32
  }
  func.func @transform_3(%arg0: i32) -> (i32, i32) {
    %c0_i32 = arith.constant 0 : i32
    %c0_i32_0 = arith.constant 0 : i32
    %c0_i32_1 = arith.constant 0 : i32
    return %c0_i32, %c0_i32_0 : i32, i32
  }
  func.func @transform_4(%arg0: i32) -> (i32, i32) {
    %c0_i32 = arith.constant 0 : i32
    %c0_i32_0 = arith.constant 0 : i32
    %c0_i32_1 = arith.constant 0 : i32
    return %c0_i32, %c0_i32_0 : i32, i32
  }
  func.func @transform_5(%arg0: i32) -> (i32, i32) {
    %c0_i32 = arith.constant 0 : i32
    %c0_i32_0 = arith.constant 0 : i32
    %c0_i32_1 = arith.constant 0 : i32
    return %c0_i32, %c0_i32_0 : i32, i32
  }
  func.func @transform_6(%arg0: i32) -> (i32, i32) {
    %c0_i32 = arith.constant 0 : i32
    %c0_i32_0 = arith.constant 0 : i32
    %c0_i32_1 = arith.constant 0 : i32
    return %c0_i32, %c0_i32_0 : i32, i32
  }
  func.func @transform_7(%arg0: i32) -> (i32, i32) {
    %c0_i32 = arith.constant 0 : i32
    %c0_i32_0 = arith.constant 0 : i32
    %c0_i32_1 = arith.constant 0 : i32
    return %c0_i32, %c0_i32_0 : i32, i32
  }
  func.func @transform_8(%arg0: i32) -> (i32, i32) {
    %c0_i32 = arith.constant 0 : i32
    %c0_i32_0 = arith.constant 0 : i32
    %c0_i32_1 = arith.constant 0 : i32
    return %c0_i32, %c0_i32_0 : i32, i32
  }
  func.func @transform_9(%arg0: i32) -> (i32, i32) {
    %c0_i32 = arith.constant 0 : i32
    %c0_i32_0 = arith.constant 0 : i32
    return %arg0, %c0_i32 : i32, i32
  }
}

</mosaic_0001>

<bundles_post_ra>
// kernel: _lambda_.1
= control target key start
LH: loop header
LB: loop body
LE: loop exit
PB: predicated region body
PF: predicated region fallthrough
CT: control target
= control target key end

     0   :  { %14 = vsyncpa [#allocation3], 0  ;;  %s983_s0 = inlined_call_operand.vmem [shape: f32[8,16], index: 0, kind: input, shape index: {}]   ;;  %s984_s1 = inlined_call_operand.vmem [shape: f32[16,128], index: 1, kind: input, shape index: {}]   ;;  %s985_s2 = inlined_call_operand.vmem [shape: f32[1,128], index: 2, kind: input, shape index: {}]   ;;  %s986_s3 = inlined_call_operand.hbm [shape: f32[128,128], index: 3, kind: input, shape index: {}]   ;;  %s987_s4 = inlined_call_operand.vmem [shape: f32[1,128], index: 4, kind: input, shape index: {}]   ;;  %s988_s5 = inlined_call_operand.hbm [shape: f32[128,128], index: 5, kind: input, shape index: {}]   ;;  %s989_s6 = inlined_call_operand.vmem [shape: f32[1,128], index: 6, kind: input, shape index: {}]   ;;  %s990_s7 = inlined_call_operand.hbm [shape: f32[128,128], index: 7, kind: input, shape index: {}]   ;;  %s991_s8 = inlined_call_operand.vmem [shape: f32[1,128], index: 8, kind: input, shape index: {}]   ;;  %s992_s9 = inlined_call_operand.hbm [shape: f32[8,128], index: 9, kind: output, shape index: {}]  }
   0x1   :  { %15 = vsyncpa [#allocation6], 0 }
   0x2   :  { %16 = vsyncpa [#allocation4], 0  ;;  %s806_s30 = smov [#allocation5]   ;;  %s807_s11 = smov [#allocation2]  }
   0x3   :  { %s42_s10 = sshll.u32 %s806_s30, 4  ;;  %s28_s12 = sshll.u32 %s807_s11, 4  ;;  %s43_s10 = int_to_ptr.vmem [resolvable:$true] %s42_s10  ;;  %s865_s12 = int_to_ptr.vmem [resolvable:$true] %s28_s12 }
   0x4   :  { %s712_s15 = scalar_lea.hbm %s988_s5, 2048 }
   0x5   :  { %p713_p0 = scmp.ne.s32.totalorder %s988_s5, %s712_s15  ;;  %p716_p1 = scmp.lt.u32.totalorder %s712_s15, %s988_s5 }
   0x7   :  { %p718_p2 = pnand %p716_p1, %p713_p0 }
   0x9   :  { %721 = shalt.err (!%p718_p2)
}
   0xa   :  { %s722_s20 = scalar_lea.vmem %s43_s10, 2048  ;;  %p727_p4 = scmp.lt.s32.totalorder %s43_s10, %s43_s10 }
   0xb   :  { %p723_p3 = scmp.ne.s32.totalorder %s43_s10, %s722_s20  ;;  %p728_p5 = scmp.lt.s32.totalorder %s722_s20, %s722_s20 }
   0xd   :  { %p729_p6 = por %p728_p5, %p727_p4 }
   0xf   :  { %p730_p7 = pnand %p729_p6, %p723_p3 }
  0x11   :  { %733 = shalt.err (!%p730_p7)
}
  0x12   :  { %s808_s21 = smov 128   ;;  %s809_s22 = smov 8  }
  0x13   :  { %48 = dma.hbm_to_vmem [thread:$0]  %s988_s5, 2048, %s43_s10, [#allocation6], %s808_s21, %s808_s21, %s809_s22  }
  0x14   :  { %s734_s27 = scalar_lea.hbm %s986_s3, 2048 }
  0x15   :  { %p735_p8 = scmp.ne.s32.totalorder %s986_s3, %s734_s27  ;;  %p738_p9 = scmp.lt.u32.totalorder %s734_s27, %s986_s3 }
  0x17   :  { %p740_p10 = pnand %p738_p9, %p735_p8 }
  0x19   :  { %743 = shalt.err (!%p740_p10)
}
  0x1a   :  { %s744_s13 = scalar_lea.vmem %s865_s12, 2048  ;;  %p749_p12 = scmp.lt.s32.totalorder %s865_s12, %s865_s12 }
  0x1b   :  { %p745_p11 = scmp.ne.s32.totalorder %s865_s12, %s744_s13  ;;  %p750_p13 = scmp.lt.s32.totalorder %s744_s13, %s744_s13 }
  0x1d   :  { %p751_p0 = por %p750_p13, %p749_p12 }
  0x1f   :  { %p752_p1 = pnand %p751_p0, %p745_p11 }
  0x21   :  { %755 = shalt.err (!%p752_p1)
}
  0x22   :  { %34 = dma.hbm_to_vmem [thread:$0]  %s986_s3, 2048, %s865_s12, [#allocation3], %s808_s21, %s808_s21, %s809_s22  }
  0x23   :  { %s810_s14 = smov [#allocation7]   ;;  %s756_s18 = scalar_lea.hbm %s990_s7, 2048 }
  0x24   :  { %s56_s15 = sshll.u32 %s810_s14, 4  ;;  %p757_p2 = scmp.ne.s32.totalorder %s990_s7, %s756_s18  ;;  %s57_s15 = int_to_ptr.vmem [resolvable:$true] %s56_s15 }
  0x25   :  { %p760_p3 = scmp.lt.u32.totalorder %s756_s18, %s990_s7 }
  0x27   :  { %p762_p4 = pnand %p760_p3, %p757_p2 }
  0x29   :  { %765 = shalt.err (!%p762_p4)
}
  0x2a   :  { %s766_s25 = scalar_lea.vmem %s57_s15, 2048  ;;  %p771_p6 = scmp.lt.s32.totalorder %s57_s15, %s57_s15 }
  0x2b   :  { %p767_p5 = scmp.ne.s32.totalorder %s57_s15, %s766_s25  ;;  %p772_p7 = scmp.lt.s32.totalorder %s766_s25, %s766_s25 }
  0x2d   :  { %p773_p8 = por %p772_p7, %p771_p6 }
  0x2f   :  { %p774_p9 = pnand %p773_p8, %p767_p5 }
  0x31   :  { %777 = shalt.err (!%p774_p9)
}
  0x32   :  { %62 = dma.hbm_to_vmem [thread:$0]  %s990_s7, 2048, %s57_s15, [#allocation6], %s808_s21, %s808_s21, %s809_s22  }
  0x33   :  { %800 = dma.done.wait [#allocation3], 2048  }
  0x34   :  { %801 = vsyncadd [#allocation3], 4294965248 }
  0x35   :  { %802 = dma.done.wait [#allocation6], 4096  }
  0x36   :  { %803 = vsyncadd [#allocation6], 4294963200  ;;  %v811_v0 = vmov 0.0|0.0   ;;  %vm812_vm0 = vmmov 0   ;;  %v813_v1 = vmov 0.0   ;;  %v75_v2 = vld [vmem:[%s984_s1] sm:$0xff] }
  0x37   :  { %628 = vmatprep.subr.bf16.mxu0 %v811_v0  ;;  %520 = vmatprep.mubr.msk.f32.mxu0 %vm812_vm0, %v813_v1  ;;  %v76_v3 = vld [vmem:[%s984_s1 + $0x8] sm:$0xff]  ;;  %v78_v5 = vld [vmem:[#allocation2] sm:$0xff]  ;;  %v79_v6 = vld [vmem:[#allocation2 + $0x8] sm:$0xff]  ;;  %vm135_vm1 = vcmask 130048   ;;  %s814_s5 = smov [#allocation8]  }
  0x38   :  { %631 = vmatprep.subr.bf16.mxu1 %v811_v0  ;;  %555 = vmatprep.mubr.msk.f32.mxu1 %vm812_vm0, %v813_v1  ;;  %v629_v4 = vpack.c.bf16 %v76_v3, %v75_v2  ;;  %v80_v7 = vld [vmem:[#allocation2 + $0x10] sm:$0xff]  ;;  %v632_v8 = vpack.c.bf16 %v79_v6, %v78_v5  ;;  %v81_v9 = vld [vmem:[#allocation2 + $0x18] sm:$0xff]  ;;  %v82_v12 = vld [vmem:[#allocation2 + $0x20] sm:$0xff]  ;;  %s447_s10 = sshll.u32 %s814_s5, 4  ;;  %s448_s10 = int_to_ptr.vmem [resolvable:$true] %s447_s10 }
  0x39   :  { %v74_v10 = vld [vmem:[%s983_s0] sm:$0xff]  ;;  %v635_v11 = vpack.c.bf16 %v81_v9, %v80_v7  ;;  %v83_v13 = vld [vmem:[#allocation2 + $0x28] sm:$0xff]  ;;  %v85_v16 = vld [vmem:[#allocation2 + $0x38] sm:$0xff]  ;;  %s778_s14 = scalar_lea.vmem %s448_s10, 128  ;;  %p783_p11 = scmp.lt.s32.totalorder %s448_s10, %s448_s10 }
  0x3a   :  { %630 = vmatpush3.bf16.msra.mxu0 %v629_v4  ;;  %633 = vmatpush3.bf16.msra.mxu1 %v632_v8  ;;  %v638_v14 = vpack.c.bf16 %v83_v13, %v82_v12  ;;  %v84_v15 = vld [vmem:[#allocation2 + $0x30] sm:$0xff]  ;;  %v86_v18 = vld [vmem:[#allocation2 + $0x40] sm:$0xff]  ;;  %v87_v19 = vld [vmem:[#allocation2 + $0x48] sm:$0xff]  ;;  %p779_p10 = scmp.ne.s32.totalorder %s448_s10, %s778_s14  ;;  %p784_p12 = scmp.lt.s32.totalorder %s778_s14, %s778_s14 }
  0x3b   :  { %655 = vmatprep.subr.bf16.mxu0 %v811_v0  ;;  %634 = vmatprep.subr.bf16.mxu1 %v811_v0  ;;  %v641_v17 = vpack.c.bf16 %v85_v16, %v84_v15  ;;  %v644_v20 = vpack.c.bf16 %v87_v19, %v86_v18  ;;  %v88_v21 = vld [vmem:[#allocation2 + $0x50] sm:$0xff]  ;;  %v89_v22 = vld [vmem:[#allocation2 + $0x58] sm:$0xff]  ;;  %v90_v24 = vld [vmem:[#allocation2 + $0x60] sm:$0xff] }
  0x3c   :  { %v647_v23 = vpack.c.bf16 %v89_v22, %v88_v21  ;;  %v91_v25 = vld [vmem:[#allocation2 + $0x68] sm:$0xff]  ;;  %v92_v27 = vld [vmem:[#allocation2 + $0x70] sm:$0xff]  ;;  %v93_v28 = vld [vmem:[#allocation2 + $0x78] sm:$0xff]  ;;  %p785_p13 = por %p784_p12, %p783_p11 }
  0x3d   :  { %521 = vmatmul.mubr.msk.f32.vlgmr.msra.gmra.mrb[0].mxu0 %vm135_vm1, %v74_v10  ;;  %v650_v26 = vpack.c.bf16 %v91_v25, %v90_v24  ;;  %v653_v29 = vpack.c.bf16 %v93_v28, %v92_v27  ;;  %v95_v30 = vld [vmem:[#allocation5] sm:$0xff]  ;;  %v96_v31 = vld [vmem:[#allocation5 + $0x8] sm:$0xff]  ;;  %v97_v32 = vld [vmem:[#allocation5 + $0x10] sm:$0xff] }
  0x3e   :  { %590 = vmatprep.mubr.msk.f32.mxu0 %vm812_vm0, %v813_v1  ;;  %636 = vmatpush3.bf16.msra.mxu1 %v635_v11  ;;  %v656_v33 = vpack.c.bf16 %v96_v31, %v95_v30  ;;  %v98_v34 = vld [vmem:[#allocation5 + $0x18] sm:$0xff]  ;;  %v99_v36 = vld [vmem:[#allocation5 + $0x20] sm:$0xff]  ;;  %v100_v37 = vld [vmem:[#allocation5 + $0x28] sm:$0xff]  ;;  %p786_p0 = pnand %p785_p13, %p779_p10 }
  0x3f   :  { %637 = vmatprep.subr.bf16.mxu1 %v811_v0  ;;  %v659_v35 = vpack.c.bf16 %v98_v34, %v97_v32  ;;  %v662_v38 = vpack.c.bf16 %v100_v37, %v99_v36  ;;  %v101_v39 = vld [vmem:[#allocation5 + $0x30] sm:$0xff]  ;;  %v102_v40 = vld [vmem:[#allocation5 + $0x38] sm:$0xff]  ;;  %v103_v42 = vld [vmem:[#allocation5 + $0x40] sm:$0xff] }
  0x40   :  { %657 = vmatpush3.bf16.msra.mxu0 %v656_v33  ;;  %v665_v41 = vpack.c.bf16 %v102_v40, %v101_v39  ;;  %v104_v43 = vld [vmem:[#allocation5 + $0x48] sm:$0xff]  ;;  %v105_v45 = vld [vmem:[#allocation5 + $0x50] sm:$0xff]  ;;  %v106_v46 = vld [vmem:[#allocation5 + $0x58] sm:$0xff] }
  0x41   :  { %658 = vmatprep.subr.bf16.mxu0 %v811_v0  ;;  %v668_v44 = vpack.c.bf16 %v104_v43, %v103_v42  ;;  %v671_v47 = vpack.c.bf16 %v106_v46, %v105_v45  ;;  %v107_v48 = vld [vmem:[#allocation5 + $0x60] sm:$0xff]  ;;  %v108_v49 = vld [vmem:[#allocation5 + $0x68] sm:$0xff]  ;;  %v457_v51 = vld [vmem:[%s985_s2] ss:$0 sm:$0xff] }
  0x42   :  { %639 = vmatpush3.bf16.msra.mxu1 %v638_v14  ;;  %v674_v50 = vpack.c.bf16 %v108_v49, %v107_v48  ;;  %v109_v56 = vld [vmem:[#allocation5 + $0x70] sm:$0xff]  ;;  %v110_v57 = vld [vmem:[#allocation5 + $0x78] sm:$0xff]  ;;  %v112_v59 = vld [vmem:[#allocation7] sm:$0xff] }
  0x43   :  { %640 = vmatprep.subr.bf16.mxu1 %v811_v0  ;;  %v677_v58 = vpack.c.bf16 %v110_v57, %v109_v56  ;;  %v113_v60 = vld [vmem:[#allocation7 + $0x8] sm:$0xff]  ;;  %v114_v61 = vld [vmem:[#allocation7 + $0x10] sm:$0xff]  ;;  %v115_v63 = vld [vmem:[#allocation7 + $0x18] sm:$0xff] }
  0x44   :  { %660 = vmatpush3.bf16.msra.mxu0 %v659_v35  ;;  %v680_v62 = vpack.c.bf16 %v113_v60, %v112_v59  ;;  %v683_v2 = vpack.c.bf16 %v115_v63, %v114_v61  ;;  %v116_v3 = vld [vmem:[#allocation7 + $0x20] sm:$0xff]  ;;  %v117_v4 = vld [vmem:[#allocation7 + $0x28] sm:$0xff]  ;;  %v119_v6 = vld [vmem:[#allocation7 + $0x38] sm:$0xff] }
  0x45   :  { %661 = vmatprep.subr.bf16.mxu0 %v811_v0  ;;  %v686_v5 = vpack.c.bf16 %v117_v4, %v116_v3  ;;  %v120_v8 = vld [vmem:[#allocation7 + $0x40] sm:$0xff]  ;;  %v121_v9 = vld [vmem:[#allocation7 + $0x48] sm:$0xff]  ;;  %v122_v11 = vld [vmem:[#allocation7 + $0x50] sm:$0xff] }
  0x46   :  { %642 = vmatpush3.bf16.msra.mxu1 %v641_v17  ;;  %v692_v10 = vpack.c.bf16 %v121_v9, %v120_v8  ;;  %v123_v12 = vld [vmem:[#allocation7 + $0x58] sm:$0xff]  ;;  %v124_v14 = vld [vmem:[#allocation7 + $0x60] sm:$0xff]  ;;  %v125_v15 = vld [vmem:[#allocation7 + $0x68] sm:$0xff] }
  0x47   :  { %643 = vmatprep.subr.bf16.mxu1 %v811_v0  ;;  %v695_v13 = vpack.c.bf16 %v123_v12, %v122_v11  ;;  %v698_v16 = vpack.c.bf16 %v125_v15, %v124_v14  ;;  %v459_v17 = vld [vmem:[%s987_s4] ss:$0 sm:$0xff] }
  0x48   :  { %663 = vmatpush3.bf16.msra.mxu0 %v662_v38  ;;  %v126_v22 = vld [vmem:[#allocation7 + $0x70] sm:$0xff] }
  0x49   :  { %664 = vmatprep.subr.bf16.mxu0 %v811_v0  ;;  %v460_v25 = vld [vmem:[%s989_s6] ss:$0 sm:$0xff] }
  0x4a   :  { %645 = vmatpush3.bf16.msra.mxu1 %v644_v20 }
  0x4b   :  { %646 = vmatprep.subr.bf16.mxu1 %v811_v0 }
  0x4c   :  { %666 = vmatpush3.bf16.msra.mxu0 %v665_v41 }
  0x4d   :  { %667 = vmatprep.subr.bf16.mxu0 %v811_v0 }
  0x4e   :  { %648 = vmatpush3.bf16.msra.mxu1 %v647_v23  ;;  %v127_v23 = vld [vmem:[#allocation7 + $0x78] sm:$0xff] }
  0x4f   :  { %649 = vmatprep.subr.bf16.mxu1 %v811_v0  ;;  %v701_v24 = vpack.c.bf16 %v127_v23, %v126_v22 }
  0x50   :  { %669 = vmatpush3.bf16.msra.mxu0 %v668_v44 }
  0x51   :  { %670 = vmatprep.subr.bf16.mxu0 %v811_v0 }
  0x52   :  { %651 = vmatpush3.bf16.msra.mxu1 %v650_v26 }
  0x53   :  { %652 = vmatprep.subr.bf16.mxu1 %v811_v0 }
  0x54   :  { %672 = vmatpush3.bf16.msra.mxu0 %v671_v47 }
  0x55   :  { %673 = vmatprep.subr.bf16.mxu0 %v811_v0 }
  0x56   :  { %654 = vmatpush3.bf16.msra.mxu1 %v653_v29  ;;  %v461_v29 = vld [vmem:[%s991_s8] ss:$0 sm:$0xff] }
  0x57   :  { %679 = vmatprep.subr.bf16.mxu1 %v811_v0 }
  0x58   :  { %675 = vmatpush3.bf16.msra.mxu0 %v674_v50 }
  0x59   :  { %676 = vmatprep.subr.bf16.mxu0 %v811_v0 }
  0x5c   :  { %678 = vmatpush3.bf16.msra.mxu0 %v677_v58 }
 0x110   :  { %v205_v52 = vpop.f32.mrb[0].mxu0 }
 0x111   :  { %v206_v53 = vadd.f32 %v457_v51, %v205_v52  ;;  %v522_v54 = vpop.f32.mrb[1].mxu0 }
 0x113   :  { %v209_v55 = vmax.f32 %v206_v53, 0.0 }
 0x115   :  { %556 = vmatmul.mubr.f32.vlgmr.msra.gmra.mrb[0].mxu1 %v209_v55 }
 0x116   :  { %625 = vmatprep.mubr.msk.f32.mxu1 %vm812_vm0, %v813_v1  ;;  %681 = vmatpush3.bf16.msra.mxu1 %v680_v62  ;;  %v118_v1 = vld [vmem:[#allocation7 + $0x30] sm:$0xff] }
 0x117   :  { %682 = vmatprep.subr.bf16.mxu1 %v811_v0  ;;  %v689_v7 = vpack.c.bf16 %v119_v6, %v118_v1 }
 0x11a   :  { %684 = vmatpush3.bf16.msra.mxu1 %v683_v2 }
 0x11b   :  { %685 = vmatprep.subr.bf16.mxu1 %v811_v0 }
 0x11e   :  { %687 = vmatpush3.bf16.msra.mxu1 %v686_v5 }
 0x11f   :  { %688 = vmatprep.subr.bf16.mxu1 %v811_v0 }
 0x122   :  { %690 = vmatpush3.bf16.msra.mxu1 %v689_v7 }
 0x123   :  { %691 = vmatprep.subr.bf16.mxu1 %v811_v0 }
 0x126   :  { %693 = vmatpush3.bf16.msra.mxu1 %v692_v10 }
 0x127   :  { %694 = vmatprep.subr.bf16.mxu1 %v811_v0 }
 0x12a   :  { %696 = vmatpush3.bf16.msra.mxu1 %v695_v13 }
 0x12b   :  { %697 = vmatprep.subr.bf16.mxu1 %v811_v0 }
 0x12e   :  { %699 = vmatpush3.bf16.msra.mxu1 %v698_v16 }
 0x12f   :  { %700 = vmatprep.subr.bf16.mxu1 %v811_v0 }
 0x132   :  { %702 = vmatpush3.bf16.msra.mxu1 %v701_v24 }
 0x1e8   :  { %v282_v18 = vpop.f32.mrb[0].mxu1 }
 0x1e9   :  { %v283_v19 = vadd.f32 %v459_v17, %v282_v18  ;;  %v557_v20 = vpop.f32.mrb[1].mxu1 }
 0x1eb   :  { %v286_v21 = vmax.f32 %v283_v19, 0.0 }
 0x1ed   :  { %591 = vmatmul.mubr.f32.vlgmr.msra.gmra.mrb[2].mxu0 %v286_v21 }
 0x2c0   :  { %v359_v26 = vpop.f32.mrb[2].mxu0 }
 0x2c1   :  { %v360_v27 = vadd.f32 %v460_v25, %v359_v26  ;;  %v592_v0 = vpop.f32.mrb[3].mxu0 }
 0x2c3   :  { %v363_v28 = vmax.f32 %v360_v27, 0.0 }
 0x2c5   :  { %626 = vmatmul.mubr.f32.vlgmr.msra.gmra.mrb[2].mxu1 %v363_v28 }
 0x398   :  { %v436_v30 = vpop.f32.mrb[2].mxu1 }
 0x399   :  { %v437_v31 = vadd.f32 %v461_v29, %v436_v30  ;;  %v627_v32 = vpop.f32.mrb[3].mxu1 }
 0x39b   :  { %440 = vst [vmem:[#allocation8] sm:$0xff] %v437_v31 }
 0x39c   :  { %789 = shalt.err (!%p786_p0)
}
 0x39d   :  { %s790_s16 = scalar_lea.hbm %s992_s9, 128 }
 0x39e   :  { %p791_p1 = scmp.ne.s32.totalorder %s992_s9, %s790_s16  ;;  %p794_p2 = scmp.lt.u32.totalorder %s790_s16, %s992_s9 }
 0x3a0   :  { %p796_p3 = pnand %p794_p2, %p791_p1 }
 0x3a2   :  { %799 = shalt.err (!%p796_p3)
}
 0x3a3   :  { %450 = dma.vmem_to_hbm [thread:$0]  %s448_s10, 128, %s992_s9, [#allocation4]  }
 0x3a4   :  { %804 = dma.done.wait [#allocation4], 128  }
 0x3a5   :  { %805 = vsyncadd [#allocation4], 4294967168 }
 0x3a6   :  { %454 = vsyncpa [#allocation3], 1 }
 0x3a7   :  { %455 = vsyncpa [#allocation6], 1 }
 0x3a8   :  { %456 = vsyncpa [#allocation4], 1 }

</bundles_post_ra>
